<compile_context>
chip_gen: v5e
topology: v5e:2x2
jax: 0.10.0
libtpu: 0.0.40
codegen_flags: <defaults>
</compile_context>

<pallas_src>
import functools

import jax
import jax.numpy as jnp
from jax.experimental import pallas as pl
from jax.experimental.pallas import tpu as pltpu

_LANE = 128      # vreg lane width
_SUBLANE = 8     # f32 sublane count


def _round_up(x, m):
    return ((x + m - 1) // m) * m


def _pad2d(a, rows, cols):
    pr, pc = rows - a.shape[0], cols - a.shape[1]
    if pr or pc:
        a = jnp.pad(a, ((0, pr), (0, pc)))
    return a


def _vmem_capacity_bytes():
    """Generation-aware VMEM capacity; conservative 64 MiB (v7x) if unknown."""
    try:
        info = pltpu.get_tpu_info()
        for attr in ("vmem_capacity_bytes", "vmem_size_bytes", "vmem_bytes"):
            v = getattr(info, attr, None)
            if v:
                return int(v)
    except Exception:
        pass
    return 64 << 20


def _resident_spec(shape):
    """BlockSpec for a grid-invariant (VMEM-resident) parameter.

    Constant index_map -> never re-fetched across grid steps; Buffered(1)
    drops the useless second buffer. Falls back silently if this JAX build
    rejects the pipeline_mode kwarg.
    """
    idx_map = lambda i: (0, 0)
    try:
        return pl.BlockSpec(shape, idx_map, pipeline_mode=pl.Buffered(1))
    except Exception:
        return pl.BlockSpec(shape, idx_map)


def _pick_batch_tile(b_rows, block_batch):
    """Batch tile: large enough to amortize per-step overhead, but >=2 grid
    steps when possible so the 'parallel' axis shards across v7x's two TCs
    (costs nothing on single-TC v5e/v6e: just two loop iterations)."""
    tb = min(block_batch, b_rows)
    if b_rows <= block_batch and b_rows >= 2 * _SUBLANE:
        tb = _round_up(-(-b_rows // 2), _SUBLANE)
    return max(tb, _SUBLANE)


# --------------------------------------------------------------------------
# parameter construction / packing (padding happens ONCE, here)
# --------------------------------------------------------------------------
def init_network_params(key, layers, param_dtype=jnp.bfloat16):
    """nn.Linear-style init. Stored as (in, out) transposed weight + (1, out) bias."""
    params = []
    for i in range(len(layers) - 1):
        key, wk, bk = jax.random.split(key, 3)
        bound = 1.0 / jnp.sqrt(jnp.float32(layers[i]))
        w = jax.random.uniform(wk, (layers[i], layers[i + 1]), jnp.float32,
                               -bound, bound).astype(param_dtype)
        b = jax.random.uniform(bk, (1, layers[i + 1]), jnp.float32, -bound, bound)
        params.append((w, b))
    return params


def pack_params(params, param_dtype=jnp.bfloat16):
    """Pad/pack parameters once (not per forward call).

    Hidden feature dims are padded to multiples of 128 (lane-dense, inert zero
    rows/cols since LeakyReLU(0)=0); the network's input and output widths
    stay exact so the kernel never DMAs padded input columns or writes padded
    output columns.
    """
    dims = [params[0][0].shape[0]] + [w.shape[1] for (w, _) in params]
    pads = list(dims)
    for j in range(1, len(dims) - 1):           # pad hidden dims only
        pads[j] = _round_up(dims[j], _LANE)
    weights, biases = [], []
    for i, (w, b) in enumerate(params):
        weights.append(_pad2d(w.astype(param_dtype), pads[i], pads[i + 1]))
        biases.append(_pad2d(b.astype(jnp.float32), 1, pads[i + 1]))
    return {
        "weights": tuple(weights),
        "biases": tuple(biases),
        "dims": tuple(dims),
        "pads": tuple(pads),
    }


# --------------------------------------------------------------------------
# fused path: whole MLP in one pallas_call, weights resident in VMEM
# --------------------------------------------------------------------------
def _fused_mlp_kernel(*refs, num_layers, slope, compute_dtype):
    """One batch tile of the whole MLP; refs = (x, w1, b1, ..., wL, bL, o)."""
    x_ref = refs[0]
    o_ref = refs[-1]
    wb = refs[1:-1]

    h = x_ref[...].astype(compute_dtype)          # bf16 straight into the MXU
    for i in range(num_layers):
        w = wb[2 * i][...].astype(compute_dtype)
        b = wb[2 * i + 1][...]                    # f32 bias
        y = jnp.dot(h, w, preferred_element_type=jnp.float32)
        y = y + b
        if i != num_layers - 1:
            y = jnp.maximum(y, slope * y)         # LeakyReLU(0.1), 2 VALU ops
            h = y.astype(compute_dtype)           # keep intermediates bf16
        else:
            h = y
    o_ref[...] = h.astype(o_ref.dtype)


# --------------------------------------------------------------------------
# fallback path: per-layer K/N-tiled linear (used when params can't be resident)
# --------------------------------------------------------------------------
def _linear_kernel(x_ref, w_ref, b_ref, o_ref, acc_ref, *, apply_act, slope,
                   compute_dtype):
    k = pl.program_id(2)

    @pl.when(k == 0)
    def _():
        acc_ref[...] = jnp.zeros_like(acc_ref)

    acc_ref[...] += jnp.dot(x_ref[...].astype(compute_dtype),
                            w_ref[...].astype(compute_dtype),
                            preferred_element_type=jnp.float32)

    @pl.when(k == pl.num_programs(2) - 1)
    def _():
        y = acc_ref[...] + b_ref[...]
        if apply_act:
            y = jnp.maximum(y, slope * y)
        o_ref[...] = y.astype(o_ref.dtype)


def _pick_tile(dim, max_tile):
    """(tile, padded_dim): full-extent block for small dims (allowed by the
    (8,128) rule), otherwise a 128-aligned tile that divides the padded dim."""
    if dim <= max_tile:
        return dim, dim
    return max_tile, _round_up(dim, max_tile)


def _linear_layer(x, w, b, *, apply_act, slope, compute_dtype, out_dtype,
                  tb, tn_max, tk_max, vmem_cap):
    bp, k_dim = x.shape
    _, n_dim = w.shape
    tk, kp = _pick_tile(k_dim, tk_max)
    tn, np_ = _pick_tile(n_dim, tn_max)
    if kp != k_dim:
        x = _pad2d(x, bp, kp)
        w = _pad2d(w, kp, n_dim)
    if np_ != n_dim:
        w = _pad2d(w, w.shape[0], np_)
        b = _pad2d(b, 1, np_)
    grid = (bp // tb, np_ // tn, kp // tk)

    est = (2 * tb * tk * x.dtype.itemsize + 2 * tk * tn * w.dtype.itemsize
           + 2 * tn * 4 + 2 * tb * tn * jnp.dtype(out_dtype).itemsize
           + tb * tn * 4 + (4 << 20))
    vmem_limit = int(min(max(est, 16 << 20), int(0.9 * vmem_cap)))

    y = pl.pallas_call(
        functools.partial(_linear_kernel, apply_act=apply_act, slope=slope,
                          compute_dtype=compute_dtype),
        out_shape=jax.ShapeDtypeStruct((bp, np_), out_dtype),
        grid=grid,
        in_specs=[pl.BlockSpec((tb, tk), lambda i, j, k: (i, k)),
                  pl.BlockSpec((tk, tn), lambda i, j, k: (k, j)),
                  pl.BlockSpec((1, tn), lambda i, j, k: (0, j))],
        out_specs=pl.BlockSpec((tb, tn), lambda i, j, k: (i, j)),
        scratch_shapes=[pltpu.VMEM((tb, tn), jnp.float32)],
        compiler_params=pltpu.CompilerParams(
            dimension_semantics=("parallel", "parallel", "arbitrary"),
            vmem_limit_bytes=vmem_limit),
    )(x, w, b)
    return y[:, :n_dim] if np_ != n_dim else y


# --------------------------------------------------------------------------
# forward
# --------------------------------------------------------------------------
def network_forward(packed, state, *, slope=0.1, block_batch=1024,
                    compute_dtype=jnp.bfloat16, force_fallback=False):
    """Forward of Network(layers): [Linear + LeakyReLU(0.1)]*(L-2), Linear."""
    weights, biases = packed["weights"], packed["biases"]
    dims, pads = packed["dims"], packed["pads"]
    num_layers = len(weights)
    in_f, out_f = dims[0], dims[-1]
    B = state.shape[0]
    assert state.shape[1] == in_f

    vmem_cap = _vmem_capacity_bytes()
    b_rows = _round_up(B, _SUBLANE)
    x_bytes = jnp.dtype(state.dtype).itemsize
    max_pad = max(pads)
    resident = sum(int(a.size) * jnp.dtype(a.dtype).itemsize
                   for a in (*weights, *biases))

    def tile_bytes(t):
        # double-buffered x/out tiles + bf16/f32 copies of the widest intermediate
        return 2 * t * in_f * x_bytes + 2 * t * out_f * x_bytes + t * max_pad * 6

    tb = _pick_batch_tile(b_rows, block_batch)
    budget = int(0.7 * vmem_cap)                 # headroom under the real cap
    while tb > _SUBLANE and resident + tile_bytes(tb) > budget:
        tb = max(_SUBLANE, _round_up(tb // 2, _SUBLANE))
    use_fused = (not force_fallback) and (resident + tile_bytes(tb) <= budget)

    if use_fused:
        b_pad = _round_up(b_rows, tb)
        x_p = _pad2d(state, b_pad, in_f)          # rows only; features untouched
        grid = (b_pad // tb,)

        in_specs = [pl.BlockSpec((tb, in_f), lambda i: (i, 0))]
        args = [x_p]
        for i in range(num_layers):
            in_specs.append(_resident_spec((pads[i], pads[i + 1])))   # weight
            in_specs.append(_resident_spec((1, pads[i + 1])))         # bias
            args += [weights[i], biases[i]]
        out_spec = pl.BlockSpec((tb, out_f), lambda i: (i, 0))

        # residents counted 2x only as slack in case Buffered(1) is not honored
        # by this build; no additional hedge on top of the explicit accounting.
        vmem_limit = int(min(max(2 * resident + tile_bytes(tb) + (4 << 20),
                                 16 << 20), int(0.9 * vmem_cap)))

        out_padded = pl.pallas_call(
            functools.partial(_fused_mlp_kernel, num_layers=num_layers,
                              slope=slope, compute_dtype=compute_dtype),
            out_shape=jax.ShapeDtypeStruct((b_pad, out_f), state.dtype),
            grid=grid,
            in_specs=in_specs,
            out_specs=out_spec,
            compiler_params=pltpu.CompilerParams(
                dimension_semantics=("parallel",),
                vmem_limit_bytes=vmem_limit),
        )(*args)
        return out_padded[:B] if b_pad != B else out_padded

    # ---- fallback: params too large to stay VMEM-resident (e.g. wide nets on
    # v7x's 64 MiB). Per-layer tiled matmul; hidden activations stay bf16 in HBM.
    tb_fb = _pick_batch_tile(b_rows, min(block_batch, 512))
    b_pad = _round_up(b_rows, tb_fb)
    h = _pad2d(state, b_pad, in_f)
    for i in range(num_layers):
        last = i == num_layers - 1
        h = _linear_layer(
            h, weights[i], biases[i],
            apply_act=not last, slope=slope, compute_dtype=compute_dtype,
            out_dtype=(state.dtype if last else compute_dtype),
            tb=tb_fb, tn_max=512, tk_max=512, vmem_cap=vmem_cap)
    return h[:B] if b_pad != B else h


def network_forward_ref(params, state, *, slope=0.1, compute_dtype=jnp.bfloat16):
    """Plain JAX reference mirroring the kernel numerics (bf16 MXU, f32 epilogue)."""
    n = len(params)
    h = state.astype(compute_dtype)
    for i, (w, b) in enumerate(params):
        y = jnp.dot(h, w.astype(compute_dtype), preferred_element_type=jnp.float32)
        y = y + b.astype(jnp.float32)
        if i != n - 1:
            y = jnp.maximum(y, slope * y)
            h = y.astype(compute_dtype)
        else:
            h = y
    return h.astype(state.dtype)


if __name__ == "__main__":
    layers = [16, 32, 32, 8]   # small MLP consistent with Network(layers)
    batch = 8

    key = jax.random.PRNGKey(0)
    key, xk = jax.random.split(key)
    state = jax.random.normal(xk, (batch, layers[0]), jnp.float32)

    params = init_network_params(key, layers, param_dtype=jnp.bfloat16)
    packed = pack_params(params)        # pad / pack once, reuse every forward

    q_ref = network_forward_ref(params, state)

    # fused resident-weights path
    q = jax.block_until_ready(network_forward(packed, state))
    assert q.shape == (batch, layers[-1])
    assert jnp.allclose(q, q_ref, atol=2e-2, rtol=2e-2)

    # exercise the non-resident (tiled per-layer) fallback on the same shapes
    q_fb = jax.block_until_ready(network_forward(packed, state, force_fallback=True))
    assert q_fb.shape == (batch, layers[-1])
    assert jnp.allclose(q_fb, q_ref, atol=2e-2, rtol=2e-2)

    print("KERNEL_OK")
</pallas_src>

<mosaic_0001>
module attributes {stable_mosaic.version = 11 : i64} {
  func.func @_fused_mlp_kernel(%arg0: i32, %arg1: memref<8x16xf32, #tpu.memory_space<vmem>>, %arg2: memref<16x128xbf16, #tpu.memory_space<vmem>>, %arg3: memref<1x128xf32, #tpu.memory_space<vmem>>, %arg4: memref<128x128xbf16, #tpu.memory_space<vmem>>, %arg5: memref<1x128xf32, #tpu.memory_space<vmem>>, %arg6: memref<128x8xbf16, #tpu.memory_space<vmem>>, %arg7: memref<1x8xf32, #tpu.memory_space<vmem>>, %arg8: memref<8x8xf32, #tpu.memory_space<vmem>>) attributes {dimension_semantics = [#tpu.dimension_semantics<parallel>], iteration_bounds = array<i64: 1>, scalar_prefetch = 0 : i64, scratch_operands = 0 : i64, tpu.core_type = #tpu.core_type<tc>, window_params = [{transform_indices = @transform_0, window_bounds = array<i64: 8, 16>}, {pipeline_mode = #tpu.pipeline_mode<synchronous>, transform_indices = @transform_1, window_bounds = array<i64: 16, 128>}, {pipeline_mode = #tpu.pipeline_mode<synchronous>, transform_indices = @transform_2, window_bounds = array<i64: 1, 128>}, {pipeline_mode = #tpu.pipeline_mode<synchronous>, transform_indices = @transform_3, window_bounds = array<i64: 128, 128>}, {pipeline_mode = #tpu.pipeline_mode<synchronous>, transform_indices = @transform_4, window_bounds = array<i64: 1, 128>}, {pipeline_mode = #tpu.pipeline_mode<synchronous>, transform_indices = @transform_5, window_bounds = array<i64: 128, 8>}, {pipeline_mode = #tpu.pipeline_mode<synchronous>, transform_indices = @transform_6, window_bounds = array<i64: 1, 8>}, {transform_indices = @transform_7, window_bounds = array<i64: 8, 8>}]} {
    %c0 = arith.constant 0 : index
    %c0_0 = arith.constant 0 : index
    %0 = vector.load %arg1[%c0, %c0_0] : memref<8x16xf32, #tpu.memory_space<vmem>>, vector<8x16xf32>
    %1 = arith.truncf %0 : vector<8x16xf32> to vector<8x16xbf16>
    %c0_1 = arith.constant 0 : index
    %c0_2 = arith.constant 0 : index
    %2 = vector.load %arg2[%c0_1, %c0_2] : memref<16x128xbf16, #tpu.memory_space<vmem>>, vector<16x128xbf16>
    %c0_3 = arith.constant 0 : index
    %c0_4 = arith.constant 0 : index
    %3 = vector.load %arg3[%c0_3, %c0_4] : memref<1x128xf32, #tpu.memory_space<vmem>>, vector<1x128xf32>
    %cst = arith.constant dense<0.000000e+00> : vector<8x128xf32>
    %4 = tpu.matmul %1, %2, %cst {dimension_numbers = #tpu.dot_dimension_numbers<[1], [0], [0], [1], [0, 0, 1, 1], [], []>} : vector<8x16xbf16>, vector<16x128xbf16>, vector<8x128xf32> -> vector<8x128xf32>
    %5 = vector.broadcast %3 : vector<1x128xf32> to vector<8x128xf32>
    %6 = arith.addf %4, %5 : vector<8x128xf32>
    %cst_5 = arith.constant 1.000000e-01 : f32
    %7 = vector.broadcast %cst_5 : f32 to vector<8x128xf32>
    %8 = arith.mulf %7, %6 : vector<8x128xf32>
    %9 = arith.maximumf %6, %8 : vector<8x128xf32>
    %10 = arith.truncf %9 : vector<8x128xf32> to vector<8x128xbf16>
    %c0_6 = arith.constant 0 : index
    %c0_7 = arith.constant 0 : index
    %11 = vector.load %arg4[%c0_6, %c0_7] : memref<128x128xbf16, #tpu.memory_space<vmem>>, vector<128x128xbf16>
    %c0_8 = arith.constant 0 : index
    %c0_9 = arith.constant 0 : index
    %12 = vector.load %arg5[%c0_8, %c0_9] : memref<1x128xf32, #tpu.memory_space<vmem>>, vector<1x128xf32>
    %cst_10 = arith.constant dense<0.000000e+00> : vector<8x128xf32>
    %13 = tpu.matmul %10, %11, %cst_10 {dimension_numbers = #tpu.dot_dimension_numbers<[1], [0], [0], [1], [0, 0, 1, 1], [], []>} : vector<8x128xbf16>, vector<128x128xbf16>, vector<8x128xf32> -> vector<8x128xf32>
    %14 = vector.broadcast %12 : vector<1x128xf32> to vector<8x128xf32>
    %15 = arith.addf %13, %14 : vector<8x128xf32>
    %cst_11 = arith.constant 1.000000e-01 : f32
    %16 = vector.broadcast %cst_11 : f32 to vector<8x128xf32>
    %17 = arith.mulf %16, %15 : vector<8x128xf32>
    %18 = arith.maximumf %15, %17 : vector<8x128xf32>
    %19 = arith.truncf %18 : vector<8x128xf32> to vector<8x128xbf16>
    %c0_12 = arith.constant 0 : index
    %c0_13 = arith.constant 0 : index
    %20 = vector.load %arg6[%c0_12, %c0_13] : memref<128x8xbf16, #tpu.memory_space<vmem>>, vector<128x8xbf16>
    %c0_14 = arith.constant 0 : index
    %c0_15 = arith.constant 0 : index
    %21 = vector.load %arg7[%c0_14, %c0_15] : memref<1x8xf32, #tpu.memory_space<vmem>>, vector<1x8xf32>
    %cst_16 = arith.constant dense<0.000000e+00> : vector<8x8xf32>
    %22 = tpu.matmul %19, %20, %cst_16 {dimension_numbers = #tpu.dot_dimension_numbers<[1], [0], [0], [1], [0, 0, 1, 1], [], []>} : vector<8x128xbf16>, vector<128x8xbf16>, vector<8x8xf32> -> vector<8x8xf32>
    %23 = vector.broadcast %21 : vector<1x8xf32> to vector<8x8xf32>
    %24 = arith.addf %22, %23 : vector<8x8xf32>
    %c0_17 = arith.constant 0 : index
    %c0_18 = arith.constant 0 : index
    %25 = vector.load %arg8[%c0_17, %c0_18] : memref<8x8xf32, #tpu.memory_space<vmem>>, vector<8x8xf32>
    tpu.vector_store %arg8[%c0_17, %c0_18], %24 {strides = array<i32>} : memref<8x8xf32, #tpu.memory_space<vmem>>, vector<8x8xf32>,
    return
  }
  func.func @transform_0(%arg0: i32) -> (i32, i32) {
    %c0_i32 = arith.constant 0 : i32
    %c0_i32_0 = arith.constant 0 : i32
    return %arg0, %c0_i32 : i32, i32
  }
  func.func @transform_1(%arg0: i32) -> (i32, i32) {
    %c0_i32 = arith.constant 0 : i32
    %c0_i32_0 = arith.constant 0 : i32
    %c0_i32_1 = arith.constant 0 : i32
    return %c0_i32, %c0_i32_0 : i32, i32
  }
  func.func @transform_2(%arg0: i32) -> (i32, i32) {
    %c0_i32 = arith.constant 0 : i32
    %c0_i32_0 = arith.constant 0 : i32
    %c0_i32_1 = arith.constant 0 : i32
    return %c0_i32, %c0_i32_0 : i32, i32
  }
  func.func @transform_3(%arg0: i32) -> (i32, i32) {
    %c0_i32 = arith.constant 0 : i32
    %c0_i32_0 = arith.constant 0 : i32
    %c0_i32_1 = arith.constant 0 : i32
    return %c0_i32, %c0_i32_0 : i32, i32
  }
  func.func @transform_4(%arg0: i32) -> (i32, i32) {
    %c0_i32 = arith.constant 0 : i32
    %c0_i32_0 = arith.constant 0 : i32
    %c0_i32_1 = arith.constant 0 : i32
    return %c0_i32, %c0_i32_0 : i32, i32
  }
  func.func @transform_5(%arg0: i32) -> (i32, i32) {
    %c0_i32 = arith.constant 0 : i32
    %c0_i32_0 = arith.constant 0 : i32
    %c0_i32_1 = arith.constant 0 : i32
    return %c0_i32, %c0_i32_0 : i32, i32
  }
  func.func @transform_6(%arg0: i32) -> (i32, i32) {
    %c0_i32 = arith.constant 0 : i32
    %c0_i32_0 = arith.constant 0 : i32
    %c0_i32_1 = arith.constant 0 : i32
    return %c0_i32, %c0_i32_0 : i32, i32
  }
  func.func @transform_7(%arg0: i32) -> (i32, i32) {
    %c0_i32 = arith.constant 0 : i32
    %c0_i32_0 = arith.constant 0 : i32
    return %arg0, %c0_i32 : i32, i32
  }
}

</mosaic_0001>

<bundles_post_ra>
// kernel: tpu_custom_call.1
= control target key start
LH: loop header
LB: loop body
LE: loop exit
PB: predicated region body
PF: predicated region fallthrough
CT: control target
= control target key end

     0   :  { %12 = vsyncpa [#allocation3], 0  ;;  %s560_s0 = inlined_call_operand.hbm [shape: f32[8,16], index: 0, kind: input, shape index: {}]   ;;  %s561_s1 = inlined_call_operand.hbm [shape: bf16[16,128], index: 1, kind: input, shape index: {}]   ;;  %s562_s2 = inlined_call_operand.vmem [shape: f32[1,128], index: 2, kind: input, shape index: {}]   ;;  %s563_s3 = inlined_call_operand.vmem [shape: bf16[128,128], index: 3, kind: input, shape index: {}]   ;;  %s564_s4 = inlined_call_operand.vmem [shape: f32[1,128], index: 4, kind: input, shape index: {}]   ;;  %s565_s5 = inlined_call_operand.vmem [shape: bf16[128,8], index: 5, kind: input, shape index: {}]   ;;  %s566_s6 = inlined_call_operand.vmem [shape: f32[1,8], index: 6, kind: input, shape index: {}]   ;;  %s567_s7 = inlined_call_operand.hbm [shape: f32[8,8], index: 7, kind: output, shape index: {}]  }
   0x1   :  { %13 = vsyncpa [#allocation6], 0 }
   0x2   :  { %14 = vsyncpa [#allocation4], 0  ;;  %s20_s26 = sshll.u32 %s560_s0, 4  ;;  %s449_s27 = smov [#allocation2]   ;;  %s21_s26 = int_to_ptr.hbm [resolvable:$true] %s20_s26 }
   0x3   :  { %s22_s28 = sshll.u32 %s449_s27, 4  ;;  %s30_s8 = sshll.u32 %s561_s1, 4  ;;  %s23_s28 = int_to_ptr.vmem [resolvable:$true] %s22_s28  ;;  %s31_s8 = int_to_ptr.hbm [resolvable:$true] %s30_s8 }
   0x4   :  { %25 = dma.hbm_to_vmem [thread:$0]  %s21_s26, 128, %s23_s28, [#allocation3]  }
   0x5   :  { %s450_s9 = smov [#allocation5]   ;;  %s451_s11 = smov 64  }
   0x6   :  { %s32_s10 = sshll.u32 %s450_s9, 4  ;;  %s452_s12 = smov 4   ;;  %s33_s10 = int_to_ptr.vmem [resolvable:$true] %s32_s10 }
   0x7   :  { %38 = dma.hbm_to_vmem [thread:$0]  %s31_s8, 128, %s33_s10, [#allocation6], %s451_s11, %s451_s11, %s452_s12  }
   0x8   :  { %443 = dma.done.wait [#allocation3], 128  }
   0x9   :  { %444 = vsyncadd [#allocation3], 4294967168 }
   0xa   :  { %445 = dma.done.wait [#allocation6], 128  }
   0xb   :  { %446 = vsyncadd [#allocation6], 4294967168  ;;  %v346_v0 = vld [vmem:[#allocation5] sm:$0xff]  ;;  %v58_v1 = vld [vmem:[#allocation2] sm:$0xff]  ;;  %vm72_vm0 = vcmask 130048   ;;  %s453_s22 = smov [#allocation7]  }
   0xc   :  { %v354_v2 = vld [vmem:[%s563_s3 + $0x38] sm:$0xff]  ;;  %v59_v3 = vpack.c.bf16 %v58_v1, %v58_v1  ;;  %83 = vmatpush.bf16.msra.mxu0 %v346_v0  ;;  %v353_v4 = vld [vmem:[%s563_s3 + $0x30] sm:$0xff]  ;;  %v352_v5 = vld [vmem:[%s563_s3 + $0x28] sm:$0xff]  ;;  %s264_s23 = sshll.u32 %s453_s22, 4  ;;  %s266_s25 = sshll.u32 %s567_s7, 4  ;;  %vm257_vm1 = vcmask 64512   ;;  %s265_s23 = int_to_ptr.vmem [resolvable:$true] %s264_s23  ;;  %s267_s25 = int_to_ptr.hbm [resolvable:$true] %s266_s25 }
   0xd   :  { %160 = vmatpush.bf16.msra.mxu1 %v354_v2  ;;  %v351_v6 = vld [vmem:[%s563_s3 + $0x20] sm:$0xff]  ;;  %v350_v7 = vld [vmem:[%s563_s3 + $0x18] sm:$0xff]  ;;  %v349_v8 = vld [vmem:[%s563_s3 + $0x10] sm:$0xff] }
   0xe   :  { %v348_v9 = vld [vmem:[%s563_s3 + $0x8] sm:$0xff]  ;;  %v347_v10 = vld [vmem:[%s563_s3] sm:$0xff]  ;;  %v362_v11 = vld [vmem:[%s565_s5 + $0x38] sm:$0xff] }
   0xf   :  { %281 = vmatmul.msk.bf16.vlgmr.msra.gmra.mxu0 %vm72_vm0, %v59_v3  ;;  %244 = vmatpush.bf16.msra.mxu2 %v362_v11  ;;  %v361_v12 = vld [vmem:[%s565_s5 + $0x30] sm:$0xff]  ;;  %v360_v13 = vld [vmem:[%s565_s5 + $0x28] sm:$0xff]  ;;  %v359_v14 = vld [vmem:[%s565_s5 + $0x20] sm:$0xff] }
  0x10   :  { %v358_v15 = vld [vmem:[%s565_s5 + $0x18] sm:$0xff]  ;;  %v357_v16 = vld [vmem:[%s565_s5 + $0x10] sm:$0xff]  ;;  %v368_v17 = vld [vmem:[%s562_s2] ss:$0 sm:$0xff] }
  0x11   :  { %161 = vmatpush.bf16.msra.mxu1 %v353_v4  ;;  %v356_v24 = vld [vmem:[%s565_s5 + $0x8] sm:$0xff]  ;;  %v355_v25 = vld [vmem:[%s565_s5] sm:$0xff] }
  0x12   :  { %v369_v26 = vld [vmem:[%s564_s4] ss:$0 sm:$0xff] }
  0x13   :  { %245 = vmatpush.bf16.msra.mxu2 %v361_v12  ;;  %v370_v33 = vld [vmem:[%s566_s6] ss:$0 sm:$0xff] }
  0x15   :  { %162 = vmatpush.bf16.msra.mxu1 %v352_v5 }
  0x17   :  { %246 = vmatpush.bf16.msra.mxu2 %v360_v13 }
  0x19   :  { %163 = vmatpush.bf16.msra.mxu1 %v351_v6 }
  0x1b   :  { %247 = vmatpush.bf16.msra.mxu2 %v359_v14 }
  0x1d   :  { %164 = vmatpush.bf16.msra.mxu1 %v350_v7 }
  0x1f   :  { %248 = vmatpush.bf16.msra.mxu2 %v358_v15 }
  0x21   :  { %165 = vmatpush.bf16.msra.mxu1 %v349_v8 }
  0x23   :  { %249 = vmatpush.bf16.msra.mxu2 %v357_v16 }
  0x25   :  { %166 = vmatpush.bf16.msra.mxu1 %v348_v9 }
  0x27   :  { %250 = vmatpush.bf16.msra.mxu2 %v356_v24 }
  0x29   :  { %167 = vmatpush.bf16.msra.mxu1 %v347_v10 }
  0x2b   :  { %251 = vmatpush.bf16.msra.mxu2 %v355_v25 }
  0x8c   :  { %v85_v18 = vpop.f32.mrf.mxu0 }
  0x8d   :  { %v86_v19 = vadd.f32 %v368_v17, %v85_v18 }
  0x8f   :  { %v89_v20 = vmul.f32 0.1, %v86_v19 }
  0x91   :  { %v90_v21 = vmax.f32 %v86_v19, %v89_v20 }
  0x93   :  { %v91_v22 = vpack.c.bf16 %v90_v21, %v90_v21 }
  0x94   :  { %v87_v23 = vpop.f32.mrf.mxu0 }
  0x95   :  { %168 = vmatmul.bf16.vlgmr.msra.gmra.mxu1 %v91_v22 }
 0x112   :  { %v169_v27 = vpop.f32.mrf.mxu1 }
 0x113   :  { %v170_v28 = vadd.f32 %v369_v26, %v169_v27 }
 0x115   :  { %v173_v29 = vmul.f32 0.1, %v170_v28 }
 0x117   :  { %v174_v30 = vmax.f32 %v170_v28, %v173_v29 }
 0x119   :  { %v175_v31 = vpack.c.bf16 %v174_v30, %v174_v30 }
 0x11a   :  { %v171_v32 = vpop.f32.mrf.mxu1 }
 0x11b   :  { %252 = vmatmul.bf16.vlgmr.msra.gmra.mxu2 %v175_v31 }
 0x19e   :  { %v253_v34 = vpop.f32.mrf.mxu2 }
 0x19f   :  { %v254_v35 = vadd.f32 %v370_v33, %v253_v34 }
 0x1a1   :  { %258 = vst.msk [vmem:[#allocation7] sm:$0xff] %vm257_vm1, %v254_v35 }
 0x1a2   :  { %269 = dma.vmem_to_hbm [thread:$0]  %s265_s23, 128, %s267_s25, [#allocation4]  }
 0x1a6   :  { %v255_v36 = vpop.f32.mrf.mxu2 }
 0x1a7   :  { %447 = dma.done.wait [#allocation4], 128  }
 0x1a8   :  { %448 = vsyncadd [#allocation4], 4294967168 }
 0x1a9   :  { %274 = vsyncpa [#allocation3], 1 }
 0x1aa   :  { %275 = vsyncpa [#allocation6], 1 }
 0x1ab   :  { %276 = vsyncpa [#allocation4], 1 }

</bundles_post_ra>
